<compile_context>
chip_gen: v6e
topology: v6e:2x2x1
jax: 0.10.0
libtpu: 0.0.40
codegen_flags: <defaults>
</compile_context>

<pallas_src>
import jax
import jax.numpy as jnp
from jax.experimental import pallas as pl
from jax.experimental.pallas import tpu as pltpu


def rgcn_layer_kernel(adj_ref, h_all_ref, h_tile_ref, w_ref, wres_ref,
                      bias_ref, bres_ref, scale_ref, shift_ref, out_ref):
    num_rels = adj_ref.shape[0]
    h_all = h_all_ref[...]                       # (N, Fin) bf16, resident

    # Relation reduction, unrolled at trace time (num_rels is a static shape).
    acc = jnp.zeros(out_ref.shape, jnp.float32)  # (TM, Fout) f32 accumulator
    for r in range(num_rels):
        # (A_r @ H) first: no cross-tile redundant work, both matmuls on MXU.
        ah = jnp.dot(adj_ref[r], h_all, preferred_element_type=jnp.float32)
        acc = acc + jnp.dot(ah.astype(jnp.bfloat16), w_ref[r],
                            preferred_element_type=jnp.float32)

    # RelGraphConv epilogue: + bias, relu (dropout = identity in eval mode).
    rgcn = jnp.maximum(acc + bias_ref[...], 0.0)
    # Residual branch: relu(Linear(node_feats)) on this dst-row tile.
    res = jnp.maximum(
        jnp.dot(h_tile_ref[...], wres_ref[...], preferred_element_type=jnp.float32)
        + bres_ref[...], 0.0)
    y = rgcn + res
    # Eval-mode BatchNorm1d folded to a single FMA: y * scale + shift.
    out_ref[...] = (y * scale_ref[...] + shift_ref[...]).astype(out_ref.dtype)


def _round_up(x, m):
    return (x + m - 1) // m * m


def rgcn_layer_forward(adj, w, h, wres, bres, bias, gamma, beta, mean, var,
                       eps=1e-5):
    num_rels, n, _ = adj.shape
    fin = h.shape[1]
    fout = w.shape[2]

    # Lane-dense padding: feature dims to multiples of 128, node dim to bf16
    # sublane multiples; dst-row tile TM keeps VMEM bounded for large graphs.
    fin_p = _round_up(fin, 128)
    fout_p = _round_up(fout, 128)
    n_p = _round_up(n, 16)
    tm = n_p if n_p <= 128 else 128
    n_p = _round_up(n_p, tm)

    f32, bf16 = jnp.float32, jnp.bfloat16
    adj_p = jnp.zeros((num_rels, n_p, n_p), f32).at[:, :n, :n].set(adj).astype(bf16)
    h_p = jnp.zeros((n_p, fin_p), f32).at[:n, :fin].set(h).astype(bf16)
    w_p = jnp.zeros((num_rels, fin_p, fout_p), f32).at[:, :fin, :fout].set(w).astype(bf16)
    wres_p = jnp.zeros((fin_p, fout_p), f32).at[:fin, :fout].set(wres).astype(bf16)

    pad_vec = lambda v: jnp.zeros((1, fout_p), f32).at[:, :fout].set(
        v.reshape(1, fout).astype(f32))
    bias_p = pad_vec(bias)
    bres_p = pad_vec(bres)
    # Fold eval-mode BatchNorm running stats into scale/shift.
    scale = gamma.reshape(-1) * jax.lax.rsqrt(var.reshape(-1) + eps)
    shift = beta.reshape(-1) - mean.reshape(-1) * scale
    scale_p = pad_vec(scale)
    shift_p = pad_vec(shift)

    keep2 = lambda i: (0, 0)
    keep3 = lambda i: (0, 0, 0)

    out = pl.pallas_call(
        rgcn_layer_kernel,
        out_shape=jax.ShapeDtypeStruct((n_p, fout_p), jnp.float32),
        grid=(n_p // tm,),
        in_specs=[
            pl.BlockSpec((num_rels, tm, n_p), lambda i: (0, i, 0)),   # A (dst tile, all rels)
            pl.BlockSpec((n_p, fin_p), keep2),                        # H full (src rows), resident
            pl.BlockSpec((tm, fin_p), lambda i: (i, 0)),              # H rows of this dst tile
            pl.BlockSpec((num_rels, fin_p, fout_p), keep3),           # W, resident
            pl.BlockSpec((fin_p, fout_p), keep2),                     # W_res, resident
            pl.BlockSpec((1, fout_p), keep2),                         # conv bias
            pl.BlockSpec((1, fout_p), keep2),                         # residual bias
            pl.BlockSpec((1, fout_p), keep2),                         # BN scale
            pl.BlockSpec((1, fout_p), keep2),                         # BN shift
        ],
        out_specs=pl.BlockSpec((tm, fout_p), lambda i: (i, 0)),
        compiler_params=pltpu.CompilerParams(
            dimension_semantics=("parallel",)),
    )(adj_p, h_p, h_p, w_p, wres_p, bias_p, bres_p, scale_p, shift_p)

    return out[:n, :fout]


if __name__ == "__main__":
    # Small shapes consistent with the module (hidden=32, a small relation
    # vocabulary instead of 64*21 for the demo).
    N, E = 16, 48               # nodes / edges in the "batched graph"
    IN_FEATS, OUT_FEATS = 32, 32
    NUM_RELS = 8                # num_bases = num_rels (basis regularizer, num_bases=None)

    key = jax.random.PRNGKey(0)
    ks = jax.random.split(key, 12)

    node_feats = jax.random.normal(ks[0], (N, IN_FEATS), jnp.float32)
    src = jax.random.randint(ks[1], (E,), 0, N)
    dst = jax.random.randint(ks[2], (E,), 0, N)
    etype = jax.random.randint(ks[3], (E,), 0, NUM_RELS)
    norm = jax.random.uniform(ks[4], (E, 1), jnp.float32, 0.1, 1.0)

    # Basis-decomposed relation weights: W_r = sum_b comp[r, b] * basis[b]
    basis = 0.1 * jax.random.normal(ks[5], (NUM_RELS, IN_FEATS, OUT_FEATS), jnp.float32)
    comp = 0.5 * jax.random.normal(ks[6], (NUM_RELS, NUM_RELS), jnp.float32)
    W = jnp.einsum('rb,bio->rio', comp, basis)                      # (R, Fin, Fout)
    conv_bias = 0.1 * jax.random.normal(ks[7], (1, OUT_FEATS), jnp.float32)

    # Residual Linear(in_feats, out_feats)
    W_res = 0.1 * jax.random.normal(ks[8], (IN_FEATS, OUT_FEATS), jnp.float32)
    b_res = 0.1 * jax.random.normal(ks[9], (1, OUT_FEATS), jnp.float32)

    # BatchNorm1d(out_feats), eval-mode running stats
    bn_gamma = 1.0 + 0.1 * jax.random.normal(ks[10], (1, OUT_FEATS), jnp.float32)
    bn_beta = 0.1 * jax.random.normal(ks[11], (1, OUT_FEATS), jnp.float32)
    bn_mean = 0.05 * jnp.arange(OUT_FEATS, dtype=jnp.float32).reshape(1, OUT_FEATS)
    bn_var = 1.0 + 0.01 * jnp.arange(OUT_FEATS, dtype=jnp.float32).reshape(1, OUT_FEATS)

    # Dense per-relation adjacency A[r, dst, src] += norm (graph-structure setup).
    adj = jnp.zeros((NUM_RELS, N, N), jnp.float32).at[etype, dst, src].add(norm[:, 0])

    out = rgcn_layer_forward(adj, W, node_feats, W_res, b_res, conv_bias,
                             bn_gamma, bn_beta, bn_mean, bn_var)
    out = jax.block_until_ready(out)

    # Pure-JAX reference using the same bf16-rounded operands the kernel consumes
    # (f32 accumulation), matching the wrapper's casting decisions.
    rnd = lambda x: x.astype(jnp.bfloat16).astype(jnp.float32)
    agg = jnp.einsum('rds,si,rio->do', rnd(adj), rnd(node_feats), rnd(W))
    rgcn = jnp.maximum(agg + conv_bias, 0.0)
    res = jnp.maximum(rnd(node_feats) @ rnd(W_res) + b_res, 0.0)
    y = rgcn + res
    scale = bn_gamma * jax.lax.rsqrt(bn_var + 1e-5)
    shift = bn_beta - bn_mean * scale
    ref = y * scale + shift

    assert out.shape == (N, OUT_FEATS)
    max_err = float(jnp.max(jnp.abs(out - ref)))
    assert jnp.allclose(out, ref, atol=2e-2, rtol=2e-2), \
        f"mismatch vs reference (max abs err {max_err})"
    print("KERNEL_OK")
</pallas_src>

<mosaic_0001>
module attributes {stable_mosaic.version = 11 : i64} {
  func.func @rgcn_layer_kernel(%arg0: i32, %arg1: memref<8x16x16xbf16, #tpu.memory_space<vmem>>, %arg2: memref<16x128xbf16, #tpu.memory_space<vmem>>, %arg3: memref<16x128xbf16, #tpu.memory_space<vmem>>, %arg4: memref<8x128x128xbf16, #tpu.memory_space<vmem>>, %arg5: memref<128x128xbf16, #tpu.memory_space<vmem>>, %arg6: memref<1x128xf32, #tpu.memory_space<vmem>>, %arg7: memref<1x128xf32, #tpu.memory_space<vmem>>, %arg8: memref<1x128xf32, #tpu.memory_space<vmem>>, %arg9: memref<1x128xf32, #tpu.memory_space<vmem>>, %arg10: memref<16x128xf32, #tpu.memory_space<vmem>>) attributes {dimension_semantics = [#tpu.dimension_semantics<parallel>], iteration_bounds = array<i64: 1>, scalar_prefetch = 0 : i64, scratch_operands = 0 : i64, tpu.core_type = #tpu.core_type<tc>, window_params = [{transform_indices = @transform_0, window_bounds = array<i64: 8, 16, 16>}, {pipeline_mode = #tpu.pipeline_mode<synchronous>, transform_indices = @transform_1, window_bounds = array<i64: 16, 128>}, {transform_indices = @transform_2, window_bounds = array<i64: 16, 128>}, {pipeline_mode = #tpu.pipeline_mode<synchronous>, transform_indices = @transform_3, window_bounds = array<i64: 8, 128, 128>}, {pipeline_mode = #tpu.pipeline_mode<synchronous>, transform_indices = @transform_4, window_bounds = array<i64: 128, 128>}, {pipeline_mode = #tpu.pipeline_mode<synchronous>, transform_indices = @transform_5, window_bounds = array<i64: 1, 128>}, {pipeline_mode = #tpu.pipeline_mode<synchronous>, transform_indices = @transform_6, window_bounds = array<i64: 1, 128>}, {pipeline_mode = #tpu.pipeline_mode<synchronous>, transform_indices = @transform_7, window_bounds = array<i64: 1, 128>}, {pipeline_mode = #tpu.pipeline_mode<synchronous>, transform_indices = @transform_8, window_bounds = array<i64: 1, 128>}, {transform_indices = @transform_9, window_bounds = array<i64: 16, 128>}]} {
    %c0 = arith.constant 0 : index
    %c0_0 = arith.constant 0 : index
    %0 = vector.load %arg2[%c0, %c0_0] : memref<16x128xbf16, #tpu.memory_space<vmem>>, vector<16x128xbf16>
    %cst = arith.constant 0.000000e+00 : f32
    %1 = vector.broadcast %cst : f32 to vector<16x128xf32>
    %c0_1 = arith.constant 0 : index
    %c0_2 = arith.constant 0 : index
    %c0_3 = arith.constant 0 : index
    %2 = vector.load %arg1[%c0_1, %c0_2, %c0_3] : memref<8x16x16xbf16, #tpu.memory_space<vmem>>, vector<1x16x16xbf16>
    %3 = vector.shape_cast %2 : vector<1x16x16xbf16> to vector<16x16xbf16>
    %cst_4 = arith.constant dense<0.000000e+00> : vector<16x128xf32>
    %4 = tpu.matmul %3, %0, %cst_4 {dimension_numbers = #tpu.dot_dimension_numbers<[1], [0], [0], [1], [0, 0, 1, 1], [], []>} : vector<16x16xbf16>, vector<16x128xbf16>, vector<16x128xf32> -> vector<16x128xf32>
    %5 = arith.truncf %4 : vector<16x128xf32> to vector<16x128xbf16>
    %c0_5 = arith.constant 0 : index
    %c0_6 = arith.constant 0 : index
    %c0_7 = arith.constant 0 : index
    %6 = vector.load %arg4[%c0_5, %c0_6, %c0_7] : memref<8x128x128xbf16, #tpu.memory_space<vmem>>, vector<1x128x128xbf16>
    %7 = vector.shape_cast %6 : vector<1x128x128xbf16> to vector<128x128xbf16>
    %cst_8 = arith.constant dense<0.000000e+00> : vector<16x128xf32>
    %8 = tpu.matmul %5, %7, %cst_8 {dimension_numbers = #tpu.dot_dimension_numbers<[1], [0], [0], [1], [0, 0, 1, 1], [], []>} : vector<16x128xbf16>, vector<128x128xbf16>, vector<16x128xf32> -> vector<16x128xf32>
    %9 = arith.addf %1, %8 : vector<16x128xf32>
    %c1 = arith.constant 1 : index
    %c0_9 = arith.constant 0 : index
    %c0_10 = arith.constant 0 : index
    %10 = vector.load %arg1[%c1, %c0_9, %c0_10] : memref<8x16x16xbf16, #tpu.memory_space<vmem>>, vector<1x16x16xbf16>
    %11 = vector.shape_cast %10 : vector<1x16x16xbf16> to vector<16x16xbf16>
    %cst_11 = arith.constant dense<0.000000e+00> : vector<16x128xf32>
    %12 = tpu.matmul %11, %0, %cst_11 {dimension_numbers = #tpu.dot_dimension_numbers<[1], [0], [0], [1], [0, 0, 1, 1], [], []>} : vector<16x16xbf16>, vector<16x128xbf16>, vector<16x128xf32> -> vector<16x128xf32>
    %13 = arith.truncf %12 : vector<16x128xf32> to vector<16x128xbf16>
    %c1_12 = arith.constant 1 : index
    %c0_13 = arith.constant 0 : index
    %c0_14 = arith.constant 0 : index
    %14 = vector.load %arg4[%c1_12, %c0_13, %c0_14] : memref<8x128x128xbf16, #tpu.memory_space<vmem>>, vector<1x128x128xbf16>
    %15 = vector.shape_cast %14 : vector<1x128x128xbf16> to vector<128x128xbf16>
    %cst_15 = arith.constant dense<0.000000e+00> : vector<16x128xf32>
    %16 = tpu.matmul %13, %15, %cst_15 {dimension_numbers = #tpu.dot_dimension_numbers<[1], [0], [0], [1], [0, 0, 1, 1], [], []>} : vector<16x128xbf16>, vector<128x128xbf16>, vector<16x128xf32> -> vector<16x128xf32>
    %17 = arith.addf %9, %16 : vector<16x128xf32>
    %c2 = arith.constant 2 : index
    %c0_16 = arith.constant 0 : index
    %c0_17 = arith.constant 0 : index
    %18 = vector.load %arg1[%c2, %c0_16, %c0_17] : memref<8x16x16xbf16, #tpu.memory_space<vmem>>, vector<1x16x16xbf16>
    %19 = vector.shape_cast %18 : vector<1x16x16xbf16> to vector<16x16xbf16>
    %cst_18 = arith.constant dense<0.000000e+00> : vector<16x128xf32>
    %20 = tpu.matmul %19, %0, %cst_18 {dimension_numbers = #tpu.dot_dimension_numbers<[1], [0], [0], [1], [0, 0, 1, 1], [], []>} : vector<16x16xbf16>, vector<16x128xbf16>, vector<16x128xf32> -> vector<16x128xf32>
    %21 = arith.truncf %20 : vector<16x128xf32> to vector<16x128xbf16>
    %c2_19 = arith.constant 2 : index
    %c0_20 = arith.constant 0 : index
    %c0_21 = arith.constant 0 : index
    %22 = vector.load %arg4[%c2_19, %c0_20, %c0_21] : memref<8x128x128xbf16, #tpu.memory_space<vmem>>, vector<1x128x128xbf16>
    %23 = vector.shape_cast %22 : vector<1x128x128xbf16> to vector<128x128xbf16>
    %cst_22 = arith.constant dense<0.000000e+00> : vector<16x128xf32>
    %24 = tpu.matmul %21, %23, %cst_22 {dimension_numbers = #tpu.dot_dimension_numbers<[1], [0], [0], [1], [0, 0, 1, 1], [], []>} : vector<16x128xbf16>, vector<128x128xbf16>, vector<16x128xf32> -> vector<16x128xf32>
    %25 = arith.addf %17, %24 : vector<16x128xf32>
    %c3 = arith.constant 3 : index
    %c0_23 = arith.constant 0 : index
    %c0_24 = arith.constant 0 : index
    %26 = vector.load %arg1[%c3, %c0_23, %c0_24] : memref<8x16x16xbf16, #tpu.memory_space<vmem>>, vector<1x16x16xbf16>
    %27 = vector.shape_cast %26 : vector<1x16x16xbf16> to vector<16x16xbf16>
    %cst_25 = arith.constant dense<0.000000e+00> : vector<16x128xf32>
    %28 = tpu.matmul %27, %0, %cst_25 {dimension_numbers = #tpu.dot_dimension_numbers<[1], [0], [0], [1], [0, 0, 1, 1], [], []>} : vector<16x16xbf16>, vector<16x128xbf16>, vector<16x128xf32> -> vector<16x128xf32>
    %29 = arith.truncf %28 : vector<16x128xf32> to vector<16x128xbf16>
    %c3_26 = arith.constant 3 : index
    %c0_27 = arith.constant 0 : index
    %c0_28 = arith.constant 0 : index
    %30 = vector.load %arg4[%c3_26, %c0_27, %c0_28] : memref<8x128x128xbf16, #tpu.memory_space<vmem>>, vector<1x128x128xbf16>
    %31 = vector.shape_cast %30 : vector<1x128x128xbf16> to vector<128x128xbf16>
    %cst_29 = arith.constant dense<0.000000e+00> : vector<16x128xf32>
    %32 = tpu.matmul %29, %31, %cst_29 {dimension_numbers = #tpu.dot_dimension_numbers<[1], [0], [0], [1], [0, 0, 1, 1], [], []>} : vector<16x128xbf16>, vector<128x128xbf16>, vector<16x128xf32> -> vector<16x128xf32>
    %33 = arith.addf %25, %32 : vector<16x128xf32>
    %c4 = arith.constant 4 : index
    %c0_30 = arith.constant 0 : index
    %c0_31 = arith.constant 0 : index
    %34 = vector.load %arg1[%c4, %c0_30, %c0_31] : memref<8x16x16xbf16, #tpu.memory_space<vmem>>, vector<1x16x16xbf16>
    %35 = vector.shape_cast %34 : vector<1x16x16xbf16> to vector<16x16xbf16>
    %cst_32 = arith.constant dense<0.000000e+00> : vector<16x128xf32>
    %36 = tpu.matmul %35, %0, %cst_32 {dimension_numbers = #tpu.dot_dimension_numbers<[1], [0], [0], [1], [0, 0, 1, 1], [], []>} : vector<16x16xbf16>, vector<16x128xbf16>, vector<16x128xf32> -> vector<16x128xf32>
    %37 = arith.truncf %36 : vector<16x128xf32> to vector<16x128xbf16>
    %c4_33 = arith.constant 4 : index
    %c0_34 = arith.constant 0 : index
    %c0_35 = arith.constant 0 : index
    %38 = vector.load %arg4[%c4_33, %c0_34, %c0_35] : memref<8x128x128xbf16, #tpu.memory_space<vmem>>, vector<1x128x128xbf16>
    %39 = vector.shape_cast %38 : vector<1x128x128xbf16> to vector<128x128xbf16>
    %cst_36 = arith.constant dense<0.000000e+00> : vector<16x128xf32>
    %40 = tpu.matmul %37, %39, %cst_36 {dimension_numbers = #tpu.dot_dimension_numbers<[1], [0], [0], [1], [0, 0, 1, 1], [], []>} : vector<16x128xbf16>, vector<128x128xbf16>, vector<16x128xf32> -> vector<16x128xf32>
    %41 = arith.addf %33, %40 : vector<16x128xf32>
    %c5 = arith.constant 5 : index
    %c0_37 = arith.constant 0 : index
    %c0_38 = arith.constant 0 : index
    %42 = vector.load %arg1[%c5, %c0_37, %c0_38] : memref<8x16x16xbf16, #tpu.memory_space<vmem>>, vector<1x16x16xbf16>
    %43 = vector.shape_cast %42 : vector<1x16x16xbf16> to vector<16x16xbf16>
    %cst_39 = arith.constant dense<0.000000e+00> : vector<16x128xf32>
    %44 = tpu.matmul %43, %0, %cst_39 {dimension_numbers = #tpu.dot_dimension_numbers<[1], [0], [0], [1], [0, 0, 1, 1], [], []>} : vector<16x16xbf16>, vector<16x128xbf16>, vector<16x128xf32> -> vector<16x128xf32>
    %45 = arith.truncf %44 : vector<16x128xf32> to vector<16x128xbf16>
    %c5_40 = arith.constant 5 : index
    %c0_41 = arith.constant 0 : index
    %c0_42 = arith.constant 0 : index
    %46 = vector.load %arg4[%c5_40, %c0_41, %c0_42] : memref<8x128x128xbf16, #tpu.memory_space<vmem>>, vector<1x128x128xbf16>
    %47 = vector.shape_cast %46 : vector<1x128x128xbf16> to vector<128x128xbf16>
    %cst_43 = arith.constant dense<0.000000e+00> : vector<16x128xf32>
    %48 = tpu.matmul %45, %47, %cst_43 {dimension_numbers = #tpu.dot_dimension_numbers<[1], [0], [0], [1], [0, 0, 1, 1], [], []>} : vector<16x128xbf16>, vector<128x128xbf16>, vector<16x128xf32> -> vector<16x128xf32>
    %49 = arith.addf %41, %48 : vector<16x128xf32>
    %c6 = arith.constant 6 : index
    %c0_44 = arith.constant 0 : index
    %c0_45 = arith.constant 0 : index
    %50 = vector.load %arg1[%c6, %c0_44, %c0_45] : memref<8x16x16xbf16, #tpu.memory_space<vmem>>, vector<1x16x16xbf16>
    %51 = vector.shape_cast %50 : vector<1x16x16xbf16> to vector<16x16xbf16>
    %cst_46 = arith.constant dense<0.000000e+00> : vector<16x128xf32>
    %52 = tpu.matmul %51, %0, %cst_46 {dimension_numbers = #tpu.dot_dimension_numbers<[1], [0], [0], [1], [0, 0, 1, 1], [], []>} : vector<16x16xbf16>, vector<16x128xbf16>, vector<16x128xf32> -> vector<16x128xf32>
    %53 = arith.truncf %52 : vector<16x128xf32> to vector<16x128xbf16>
    %c6_47 = arith.constant 6 : index
    %c0_48 = arith.constant 0 : index
    %c0_49 = arith.constant 0 : index
    %54 = vector.load %arg4[%c6_47, %c0_48, %c0_49] : memref<8x128x128xbf16, #tpu.memory_space<vmem>>, vector<1x128x128xbf16>
    %55 = vector.shape_cast %54 : vector<1x128x128xbf16> to vector<128x128xbf16>
    %cst_50 = arith.constant dense<0.000000e+00> : vector<16x128xf32>
    %56 = tpu.matmul %53, %55, %cst_50 {dimension_numbers = #tpu.dot_dimension_numbers<[1], [0], [0], [1], [0, 0, 1, 1], [], []>} : vector<16x128xbf16>, vector<128x128xbf16>, vector<16x128xf32> -> vector<16x128xf32>
    %57 = arith.addf %49, %56 : vector<16x128xf32>
    %c7 = arith.constant 7 : index
    %c0_51 = arith.constant 0 : index
    %c0_52 = arith.constant 0 : index
    %58 = vector.load %arg1[%c7, %c0_51, %c0_52] : memref<8x16x16xbf16, #tpu.memory_space<vmem>>, vector<1x16x16xbf16>
    %59 = vector.shape_cast %58 : vector<1x16x16xbf16> to vector<16x16xbf16>
    %cst_53 = arith.constant dense<0.000000e+00> : vector<16x128xf32>
    %60 = tpu.matmul %59, %0, %cst_53 {dimension_numbers = #tpu.dot_dimension_numbers<[1], [0], [0], [1], [0, 0, 1, 1], [], []>} : vector<16x16xbf16>, vector<16x128xbf16>, vector<16x128xf32> -> vector<16x128xf32>
    %61 = arith.truncf %60 : vector<16x128xf32> to vector<16x128xbf16>
    %c7_54 = arith.constant 7 : index
    %c0_55 = arith.constant 0 : index
    %c0_56 = arith.constant 0 : index
    %62 = vector.load %arg4[%c7_54, %c0_55, %c0_56] : memref<8x128x128xbf16, #tpu.memory_space<vmem>>, vector<1x128x128xbf16>
    %63 = vector.shape_cast %62 : vector<1x128x128xbf16> to vector<128x128xbf16>
    %cst_57 = arith.constant dense<0.000000e+00> : vector<16x128xf32>
    %64 = tpu.matmul %61, %63, %cst_57 {dimension_numbers = #tpu.dot_dimension_numbers<[1], [0], [0], [1], [0, 0, 1, 1], [], []>} : vector<16x128xbf16>, vector<128x128xbf16>, vector<16x128xf32> -> vector<16x128xf32>
    %65 = arith.addf %57, %64 : vector<16x128xf32>
    %c0_58 = arith.constant 0 : index
    %c0_59 = arith.constant 0 : index
    %66 = vector.load %arg6[%c0_58, %c0_59] : memref<1x128xf32, #tpu.memory_space<vmem>>, vector<1x128xf32>
    %67 = vector.broadcast %66 : vector<1x128xf32> to vector<16x128xf32>
    %68 = arith.addf %65, %67 : vector<16x128xf32>
    %cst_60 = arith.constant 0.000000e+00 : f32
    %69 = vector.broadcast %cst_60 : f32 to vector<16x128xf32>
    %70 = arith.maximumf %68, %69 : vector<16x128xf32>
    %c0_61 = arith.constant 0 : index
    %c0_62 = arith.constant 0 : index
    %71 = vector.load %arg3[%c0_61, %c0_62] : memref<16x128xbf16, #tpu.memory_space<vmem>>, vector<16x128xbf16>
    %c0_63 = arith.constant 0 : index
    %c0_64 = arith.constant 0 : index
    %72 = vector.load %arg5[%c0_63, %c0_64] : memref<128x128xbf16, #tpu.memory_space<vmem>>, vector<128x128xbf16>
    %cst_65 = arith.constant dense<0.000000e+00> : vector<16x128xf32>
    %73 = tpu.matmul %71, %72, %cst_65 {dimension_numbers = #tpu.dot_dimension_numbers<[1], [0], [0], [1], [0, 0, 1, 1], [], []>} : vector<16x128xbf16>, vector<128x128xbf16>, vector<16x128xf32> -> vector<16x128xf32>
    %c0_66 = arith.constant 0 : index
    %c0_67 = arith.constant 0 : index
    %74 = vector.load %arg7[%c0_66, %c0_67] : memref<1x128xf32, #tpu.memory_space<vmem>>, vector<1x128xf32>
    %75 = vector.broadcast %74 : vector<1x128xf32> to vector<16x128xf32>
    %76 = arith.addf %73, %75 : vector<16x128xf32>
    %cst_68 = arith.constant 0.000000e+00 : f32
    %77 = vector.broadcast %cst_68 : f32 to vector<16x128xf32>
    %78 = arith.maximumf %76, %77 : vector<16x128xf32>
    %79 = arith.addf %70, %78 : vector<16x128xf32>
    %c0_69 = arith.constant 0 : index
    %c0_70 = arith.constant 0 : index
    %80 = vector.load %arg8[%c0_69, %c0_70] : memref<1x128xf32, #tpu.memory_space<vmem>>, vector<1x128xf32>
    %81 = vector.broadcast %80 : vector<1x128xf32> to vector<16x128xf32>
    %82 = arith.mulf %79, %81 : vector<16x128xf32>
    %c0_71 = arith.constant 0 : index
    %c0_72 = arith.constant 0 : index
    %83 = vector.load %arg9[%c0_71, %c0_72] : memref<1x128xf32, #tpu.memory_space<vmem>>, vector<1x128xf32>
    %84 = vector.broadcast %83 : vector<1x128xf32> to vector<16x128xf32>
    %85 = arith.addf %82, %84 : vector<16x128xf32>
    %c0_73 = arith.constant 0 : index
    %c0_74 = arith.constant 0 : index
    %86 = vector.load %arg10[%c0_73, %c0_74] : memref<16x128xf32, #tpu.memory_space<vmem>>, vector<16x128xf32>
    tpu.vector_store %arg10[%c0_73, %c0_74], %85 {strides = array<i32>} : memref<16x128xf32, #tpu.memory_space<vmem>>, vector<16x128xf32>,
    return
  }
  func.func @transform_0(%arg0: i32) -> (i32, i32, i32) {
    %c0_i32 = arith.constant 0 : i32
    %c0_i32_0 = arith.constant 0 : i32
    %c0_i32_1 = arith.constant 0 : i32
    return %c0_i32, %arg0, %c0_i32_0 : i32, i32, i32
  }
  func.func @transform_1(%arg0: i32) -> (i32, i32) {
    %c0_i32 = arith.constant 0 : i32
    %c0_i32_0 = arith.constant 0 : i32
    %c0_i32_1 = arith.constant 0 : i32
    return %c0_i32, %c0_i32_0 : i32, i32
  }
  func.func @transform_2(%arg0: i32) -> (i32, i32) {
    %c0_i32 = arith.constant 0 : i32
    %c0_i32_0 = arith.constant 0 : i32
    return %arg0, %c0_i32 : i32, i32
  }
  func.func @transform_3(%arg0: i32) -> (i32, i32, i32) {
    %c0_i32 = arith.constant 0 : i32
    %c0_i32_0 = arith.constant 0 : i32
    %c0_i32_1 = arith.constant 0 : i32
    %c0_i32_2 = arith.constant 0 : i32
    return %c0_i32, %c0_i32_0, %c0_i32_1 : i32, i32, i32
  }
  func.func @transform_4(%arg0: i32) -> (i32, i32) {
    %c0_i32 = arith.constant 0 : i32
    %c0_i32_0 = arith.constant 0 : i32
    %c0_i32_1 = arith.constant 0 : i32
    return %c0_i32, %c0_i32_0 : i32, i32
  }
  func.func @transform_5(%arg0: i32) -> (i32, i32) {
    %c0_i32 = arith.constant 0 : i32
    %c0_i32_0 = arith.constant 0 : i32
    %c0_i32_1 = arith.constant 0 : i32
    return %c0_i32, %c0_i32_0 : i32, i32
  }
  func.func @transform_6(%arg0: i32) -> (i32, i32) {
    %c0_i32 = arith.constant 0 : i32
    %c0_i32_0 = arith.constant 0 : i32
    %c0_i32_1 = arith.constant 0 : i32
    return %c0_i32, %c0_i32_0 : i32, i32
  }
  func.func @transform_7(%arg0: i32) -> (i32, i32) {
    %c0_i32 = arith.constant 0 : i32
    %c0_i32_0 = arith.constant 0 : i32
    %c0_i32_1 = arith.constant 0 : i32
    return %c0_i32, %c0_i32_0 : i32, i32
  }
  func.func @transform_8(%arg0: i32) -> (i32, i32) {
    %c0_i32 = arith.constant 0 : i32
    %c0_i32_0 = arith.constant 0 : i32
    %c0_i32_1 = arith.constant 0 : i32
    return %c0_i32, %c0_i32_0 : i32, i32
  }
  func.func @transform_9(%arg0: i32) -> (i32, i32) {
    %c0_i32 = arith.constant 0 : i32
    %c0_i32_0 = arith.constant 0 : i32
    return %arg0, %c0_i32 : i32, i32
  }
}

</mosaic_0001>

<bundles_post_ra>
// kernel: tpu_custom_call.1
= control target key start
LH: loop header
LB: loop body
LE: loop exit
PB: predicated region body
PF: predicated region fallthrough
CT: control target
= control target key end

     0   :  { %14 = vsyncpa [#allocation3], 0  ;;  %s2459_s0 = inlined_call_operand.hbm [shape: bf16[8,16,16], index: 0, kind: input, shape index: {}]   ;;  %s2460_s1 = inlined_call_operand.hbm [shape: bf16[16,128], index: 1, kind: input, shape index: {}]   ;;  %s2461_s2 = inlined_call_operand.hbm [shape: bf16[16,128], index: 2, kind: input, shape index: {}]   ;;  %s2462_s3 = inlined_call_operand.hbm [shape: bf16[8,128,128], index: 3, kind: input, shape index: {}]   ;;  %s2463_s4 = inlined_call_operand.hbm [shape: bf16[128,128], index: 4, kind: input, shape index: {}]   ;;  %s2464_s5 = inlined_call_operand.vmem [shape: f32[1,128], index: 5, kind: input, shape index: {}]   ;;  %s2465_s6 = inlined_call_operand.vmem [shape: f32[1,128], index: 6, kind: input, shape index: {}]   ;;  %s2466_s7 = inlined_call_operand.vmem [shape: f32[1,128], index: 7, kind: input, shape index: {}]   ;;  %s2467_s8 = inlined_call_operand.vmem [shape: f32[1,128], index: 8, kind: input, shape index: {}]   ;;  %s2468_s9 = inlined_call_operand.hbm [shape: f32[16,128], index: 9, kind: output, shape index: {}]  }
   0x1   :  { %15 = vsyncpa [#allocation6], 0 }
   0x2   :  { %16 = vsyncpa [#allocation9], 0 }
   0x3   :  { %17 = vsyncpa [#allocation4], 0  ;;  %s2208_s30 = smov [#allocation5]   ;;  %s2209_s11 = smov [#allocation8]  }
   0x4   :  { %s35_s10 = sshll.u32 %s2208_s30, 4  ;;  %s59_s12 = sshll.u32 %s2209_s11, 4  ;;  %s36_s10 = int_to_ptr.vmem [resolvable:$true] %s35_s10  ;;  %s60_s12 = int_to_ptr.vmem [resolvable:$true] %s59_s12 }
   0x5   :  { %s2088_s13 = scalar_lea.vmem %s36_s10, 128  ;;  %p2093_p1 = scmp.lt.s32.totalorder %s36_s10, %s36_s10 }
   0x6   :  { %p2089_p0 = scmp.ne.s32.totalorder %s36_s10, %s2088_s13  ;;  %p2094_p2 = scmp.lt.s32.totalorder %s2088_s13, %s2088_s13 }
   0x8   :  { %p2095_p3 = por %p2094_p2, %p2093_p1 }
   0xa   :  { %p2096_p4 = pnand %p2095_p3, %p2089_p0 }
   0xc   :  { %2099 = shalt.err (!%p2096_p4)
}
   0xd   :  { %s2210_s14 = smov 64   ;;  %s2211_s15 = smov 4  }
   0xe   :  { %41 = dma.hbm_to_vmem [thread:$0]  %s2460_s1, 128, %s36_s10, [#allocation6], %s2210_s14, %s2210_s14, %s2211_s15  }
   0xf   :  { %s2108_s18 = scalar_lea.vmem %s60_s12, 8192  ;;  %p2113_p6 = scmp.lt.s32.totalorder %s60_s12, %s60_s12 }
  0x10   :  { %p2109_p5 = scmp.ne.s32.totalorder %s60_s12, %s2108_s18  ;;  %p2114_p7 = scmp.lt.s32.totalorder %s2108_s18, %s2108_s18 }
  0x12   :  { %p2115_p8 = por %p2114_p7, %p2113_p6 }
  0x14   :  { %p2116_p9 = pnand %p2115_p8, %p2109_p5 }
  0x16   :  { %2119 = shalt.err (!%p2116_p9)
}
  0x17   :  { %65 = dma.hbm_to_vmem [thread:$0]  %s2462_s3, 8192, %s60_s12, [#allocation9], %s2210_s14, %s2210_s14, %s2211_s15  }
  0x18   :  { %s2212_s21 = smov [#allocation2]   ;;  %s2213_s23 = smov [#allocation7]  }
  0x19   :  { %s23_s22 = sshll.u32 %s2212_s21, 4  ;;  %s47_s24 = sshll.u32 %s2213_s23, 4  ;;  %s24_s22 = int_to_ptr.vmem [resolvable:$true] %s23_s22  ;;  %s48_s24 = int_to_ptr.vmem [resolvable:$true] %s47_s24 }
  0x1a   :  { %s2128_s1 = scalar_lea.vmem %s24_s22, 1024  ;;  %p2133_p11 = scmp.lt.s32.totalorder %s24_s22, %s24_s22 }
  0x1b   :  { %p2129_p10 = scmp.ne.s32.totalorder %s24_s22, %s2128_s1  ;;  %p2134_p12 = scmp.lt.s32.totalorder %s2128_s1, %s2128_s1 }
  0x1d   :  { %p2135_p13 = por %p2134_p12, %p2133_p11 }
  0x1f   :  { %p2136_p0 = pnand %p2135_p13, %p2129_p10 }
  0x21   :  { %2139 = shalt.err (!%p2136_p0)
}
  0x22   :  { %29 = dma.hbm_to_vmem [thread:$0]  %s2459_s0, 1024, %s24_s22, [#allocation3], %s2210_s14, %s2210_s14, %s2211_s15  }
  0x23   :  { %s2148_s3 = scalar_lea.vmem %s48_s24, 128  ;;  %p2153_p2 = scmp.lt.s32.totalorder %s48_s24, %s48_s24 }
  0x24   :  { %p2149_p1 = scmp.ne.s32.totalorder %s48_s24, %s2148_s3  ;;  %p2154_p3 = scmp.lt.s32.totalorder %s2148_s3, %s2148_s3 }
  0x26   :  { %p2155_p4 = por %p2154_p3, %p2153_p2 }
  0x28   :  { %p2156_p5 = pnand %p2155_p4, %p2149_p1 }
  0x2a   :  { %2159 = shalt.err (!%p2156_p5)
}
  0x2b   :  { %53 = dma.hbm_to_vmem [thread:$0]  %s2461_s2, 128, %s48_s24, [#allocation6], %s2210_s14, %s2210_s14, %s2211_s15  }
  0x2c   :  { %s2214_s29 = smov [#allocation10]  }
  0x2d   :  { %s71_s30 = sshll.u32 %s2214_s29, 4  ;;  %s72_s30 = int_to_ptr.vmem [resolvable:$true] %s71_s30 }
  0x2e   :  { %s2168_s10 = scalar_lea.vmem %s72_s30, 1024  ;;  %p2173_p7 = scmp.lt.s32.totalorder %s72_s30, %s72_s30 }
  0x2f   :  { %p2169_p6 = scmp.ne.s32.totalorder %s72_s30, %s2168_s10  ;;  %p2174_p8 = scmp.lt.s32.totalorder %s2168_s10, %s2168_s10 }
  0x31   :  { %p2175_p9 = por %p2174_p8, %p2173_p7 }
  0x33   :  { %p2176_p10 = pnand %p2175_p9, %p2169_p6 }
  0x35   :  { %2179 = shalt.err (!%p2176_p10)
}
  0x36   :  { %77 = dma.hbm_to_vmem [thread:$0]  %s2463_s4, 1024, %s72_s30, [#allocation9], %s2210_s14, %s2210_s14, %s2211_s15  }
  0x37   :  { %2200 = dma.done.wait [#allocation3], 1024  }
  0x38   :  { %2201 = vsyncadd [#allocation3], 4294966272 }
  0x39   :  { %2202 = dma.done.wait [#allocation6], 256  }
  0x3a   :  { %2203 = vsyncadd [#allocation6], 4294967040 }
  0x3b   :  { %2204 = dma.done.wait [#allocation9], 9216  }
  0x3c   :  { %2205 = vsyncadd [#allocation9], 4294958080  ;;  %v2215_v0 = vmov 0.0   ;;  %vm2216_vm0 = vmmov 0   ;;  %v2306_v1 = vld [vmem:[#allocation5] sm:$0xff]   ;;  %vm117_vm1 = vcmask 130048  }
  0x3d   :  { %1758 = vmatprep.subr.bf16.mxu0 %v2215_v0  ;;  %1764 = vmatprep.subr.bf16.mxu1 %v2215_v0  ;;  %v1999_v2 = vld [vmem:[#allocation2] sm:$0xff]   ;;  %v2000_v3 = vld [vmem:[#allocation2 + $0x8] sm:$0xff]   ;;  %v2005_v8 = vld [vmem:[#allocation8 + $0x68] sm:$0xff]  }
  0x3e   :  { %1760 = vmatprep.mubr.msk.bf16.mxu0 %vm2216_vm0, %v2215_v0  ;;  %1766 = vmatprep.mubr.msk.bf16.mxu1 %vm2216_vm0, %v2215_v0  ;;  %v2001_v4 = vld [vmem:[#allocation8 + $0x78] sm:$0xff]   ;;  %v2003_v6 = vld [vmem:[#allocation8 + $0x70] sm:$0xff]   ;;  %v2006_v9 = vld [vmem:[#allocation8 + $0x28] sm:$0xff]  }
  0x3f   :  { %1759 = vmatpush3.bf16.msra.mxu0 %v2306_v1  ;;  %1765 = vmatpush3.bf16.msra.mxu1 %v2306_v1  ;;  %v2002_v5 = vld [vmem:[#allocation8 + $0x38] sm:$0xff]   ;;  %v2004_v7 = vld [vmem:[#allocation8 + $0x30] sm:$0xff]   ;;  %v2007_v10 = vld [vmem:[#allocation8 + $0x60] sm:$0xff]  }
  0x40   :  { %1770 = vmatprep.subr.bf16.mxu0 %v2215_v0  ;;  %1790 = vmatprep.subr.bf16.mxu1 %v2215_v0  ;;  %v2008_v11 = vld [vmem:[#allocation8 + $0x20] sm:$0xff]   ;;  %v2009_v12 = vld [vmem:[#allocation8 + $0x58] sm:$0xff]   ;;  %v2011_v14 = vld [vmem:[#allocation8 + $0x50] sm:$0xff]  }
  0x41   :  { %v2010_v13 = vld [vmem:[#allocation8 + $0x18] sm:$0xff]   ;;  %v2012_v15 = vld [vmem:[#allocation8 + $0x10] sm:$0xff]   ;;  %v2013_v16 = vld [vmem:[#allocation8 + $0x48] sm:$0xff]  }
  0x42   :  { %1761 = vmatmul.mubr.msk.bf16.vlgmr.msra.gmra.mxu0 %vm117_vm1, %v1999_v2  ;;  %1767 = vmatmul.mubr.msk.bf16.vlgmr.msra.gmra.mxu1 %vm117_vm1, %v2000_v3  ;;  %v2014_v17 = vld [vmem:[#allocation8 + $0x8] sm:$0xff]   ;;  %v2015_v18 = vld [vmem:[#allocation8 + $0x40] sm:$0xff]   ;;  %v2019_v28 = vld [vmem:[#allocation8 + $0xb8] sm:$0xff]  }
  0x43   :  { %1771 = vmatpush3.bf16.msra.mxu0 %v2001_v4  ;;  %1791 = vmatpush3.bf16.msra.mxu1 %v2002_v5  ;;  %v2016_v19 = vld [vmem:[#allocation8] sm:$0xff]   ;;  %v2020_v31 = vld [vmem:[#allocation8 + $0xb0] sm:$0xff]   ;;  %v2022_v33 = vld [vmem:[#allocation8 + $0xa8] sm:$0xff]  }
  0x44   :  { %1772 = vmatprep.subr.bf16.mxu0 %v2215_v0  ;;  %1792 = vmatprep.subr.bf16.mxu1 %v2215_v0  ;;  %v2017_v32 = vld [vmem:[#allocation2 + $0x10] sm:$0xff]   ;;  %v2018_v35 = vld [vmem:[#allocation2 + $0x18] sm:$0xff]   ;;  %v2021_v36 = vld [vmem:[#allocation8 + $0xf8] sm:$0xff]  }
  0x45   :  { %1786 = vmatprep.mubr.msk.bf16.mxu0 %vm2216_vm0, %v2215_v0  ;;  %1806 = vmatprep.mubr.msk.bf16.mxu1 %vm2216_vm0, %v2215_v0  ;;  %v2024_v34 = vld [vmem:[#allocation8 + $0xa0] sm:$0xff]   ;;  %v2023_v37 = vld [vmem:[#allocation8 + $0xf0] sm:$0xff]   ;;  %v2025_v38 = vld [vmem:[#allocation8 + $0xe8] sm:$0xff]  }
  0x46   :  { %v2026_v39 = vld [vmem:[#allocation8 + $0x98] sm:$0xff]   ;;  %v2027_v40 = vld [vmem:[#allocation8 + $0xe0] sm:$0xff]   ;;  %v2028_v41 = vld [vmem:[#allocation8 + $0x90] sm:$0xff]  }
  0x47   :  { %1773 = vmatpush3.bf16.msra.mxu0 %v2003_v6  ;;  %1793 = vmatpush3.bf16.msra.mxu1 %v2004_v7  ;;  %v2029_v42 = vld [vmem:[#allocation8 + $0xd8] sm:$0xff]   ;;  %v2030_v43 = vld [vmem:[#allocation8 + $0x88] sm:$0xff]   ;;  %v2031_v44 = vld [vmem:[#allocation8 + $0xd0] sm:$0xff]  }
  0x48   :  { %1774 = vmatprep.subr.bf16.mxu0 %v2215_v0  ;;  %1794 = vmatprep.subr.bf16.mxu1 %v2215_v0  ;;  %v2032_v45 = vld [vmem:[#allocation8 + $0x80] sm:$0xff]   ;;  %v2033_v46 = vld [vmem:[#allocation8 + $0xc8] sm:$0xff]   ;;  %v2037_v61 = vld [vmem:[#allocation8 + $0x138] sm:$0xff]  }
  0x49   :  { %v2034_v47 = vld [vmem:[#allocation8 + $0xc0] sm:$0xff]   ;;  %v2038_v3 = vld [vmem:[#allocation8 + $0x130] sm:$0xff]   ;;  %v2039_v7 = vld [vmem:[#allocation8 + $0x128] sm:$0xff]  }
  0x4b   :  { %1775 = vmatpush3.bf16.msra.mxu0 %v2005_v8  ;;  %1795 = vmatpush3.bf16.msra.mxu1 %v2006_v9  ;;  %v2035_v9 = vld [vmem:[#allocation2 + $0x20] sm:$0xff]  }
  0x4c   :  { %1776 = vmatprep.subr.bf16.mxu0 %v2215_v0  ;;  %1796 = vmatprep.subr.bf16.mxu1 %v2215_v0 }
  0x4f   :  { %1777 = vmatpush3.bf16.msra.mxu0 %v2007_v10  ;;  %1797 = vmatpush3.bf16.msra.mxu1 %v2008_v11  ;;  %v2036_v10 = vld [vmem:[#allocation2 + $0x28] sm:$0xff]  }
  0x50   :  { %1778 = vmatprep.subr.bf16.mxu0 %v2215_v0  ;;  %1798 = vmatprep.subr.bf16.mxu1 %v2215_v0  ;;  %v2040_v11 = vld [vmem:[#allocation8 + $0x178] sm:$0xff]  }
  0x53   :  { %1779 = vmatpush3.bf16.msra.mxu0 %v2009_v12  ;;  %1799 = vmatpush3.bf16.msra.mxu1 %v2010_v13  ;;  %v2041_v12 = vld [vmem:[#allocation8 + $0x120] sm:$0xff]   ;;  %v2042_v13 = vld [vmem:[#allocation8 + $0x170] sm:$0xff]  }
  0x54   :  { %1780 = vmatprep.subr.bf16.mxu0 %v2215_v0  ;;  %1800 = vmatprep.subr.bf16.mxu1 %v2215_v0 }
  0x57   :  { %1781 = vmatpush3.bf16.msra.mxu0 %v2011_v14  ;;  %1801 = vmatpush3.bf16.msra.mxu1 %v2012_v15  ;;  %v2043_v14 = vld [vmem:[#allocation8 + $0x118] sm:$0xff]   ;;  %v2044_v15 = vld [vmem:[#allocation8 + $0x168] sm:$0xff]  }
  0x58   :  { %1782 = vmatprep.subr.bf16.mxu0 %v2215_v0  ;;  %1802 = vmatprep.subr.bf16.mxu1 %v2215_v0 }
  0x5b   :  { %1783 = vmatpush3.bf16.msra.mxu0 %v2013_v16  ;;  %1803 = vmatpush3.bf16.msra.mxu1 %v2014_v17  ;;  %v2045_v16 = vld [vmem:[#allocation8 + $0x110] sm:$0xff]   ;;  %v2046_v17 = vld [vmem:[#allocation8 + $0x160] sm:$0xff]  }
  0x5c   :  { %1784 = vmatprep.subr.bf16.mxu0 %v2215_v0  ;;  %1804 = vmatprep.subr.bf16.mxu1 %v2215_v0 }
  0x5f   :  { %1785 = vmatpush3.bf16.msra.mxu0 %v2015_v18  ;;  %1805 = vmatpush3.bf16.msra.mxu1 %v2016_v19  ;;  %v2047_v18 = vld [vmem:[#allocation8 + $0x108] sm:$0xff]   ;;  %v2048_v19 = vld [vmem:[#allocation8 + $0x158] sm:$0xff]  }
  0x60   :  { %1810 = vmatprep.subr.bf16.mxu0 %v2215_v0  ;;  %1816 = vmatprep.subr.bf16.mxu1 %v2215_v0 }
 0x102   :  { %v155_v20 = vpop.f32.mrf.mxu0  ;;  %v224_v21 = vpop.f32.mrf.mxu1 }
 0x104   :  { %v1762_v22 = vpop.f32.mrf.mxu0  ;;  %v1768_v23 = vpop.f32.mrf.mxu1 }
 0x105   :  { %v2051_v22 = vld [vmem:[#allocation8 + $0x148] sm:$0xff]   ;;  %v2052_v23 = vld [vmem:[#allocation8 + $0x140] sm:$0xff]  }
 0x106   :  { %v158_v24 = vpop.f32.mrf.mxu0  ;;  %v227_v25 = vpop.f32.mrf.mxu1 }
 0x107   :  { %v162_v26 = vpack.c.bf16 %v158_v24, %v155_v20  ;;  %v231_v27 = vpack.c.bf16 %v227_v25, %v224_v21  ;;  %v2049_v20 = vld [vmem:[#allocation8 + $0x100] sm:$0xff]   ;;  %v2050_v21 = vld [vmem:[#allocation8 + $0x150] sm:$0xff]  }
 0x108   :  { %v1769_v29 = vpop.f32.mrf.mxu1  ;;  %v1763_v30 = vpop.f32.mrf.mxu0 }
 0x109   :  { %1787 = vmatmul.mubr.bf16.vlgmr.msra.gmra.mxu0 %v231_v27  ;;  %1807 = vmatmul.mubr.bf16.vlgmr.msra.gmra.mxu1 %v162_v26 }
 0x10a   :  { %1811 = vmatpush3.bf16.msra.mxu0 %v2306_v1  ;;  %1812 = vmatprep.mubr.msk.bf16.mxu0 %vm2216_vm0, %v2215_v0 }
 0x10b   :  { %1836 = vmatprep.subr.bf16.mxu0 %v2215_v0  ;;  %1817 = vmatpush3.bf16.msra.mxu1 %v2019_v28 }
 0x10c   :  { %1818 = vmatprep.subr.bf16.mxu1 %v2215_v0  ;;  %1832 = vmatprep.mubr.msk.bf16.mxu1 %vm2216_vm0, %v2215_v0 }
 0x10f   :  { %1819 = vmatpush3.bf16.msra.mxu1 %v2020_v31 }
 0x110   :  { %1820 = vmatprep.subr.bf16.mxu1 %v2215_v0 }
 0x111   :  { %1813 = vmatmul.mubr.msk.bf16.vlgmr.msra.gmra.mxu0 %vm117_vm1, %v2017_v32 }
 0x112   :  { %1837 = vmatpush3.bf16.msra.mxu0 %v2306_v1  ;;  %1838 = vmatprep.mubr.msk.bf16.mxu0 %vm2216_vm0, %v2215_v0 }
 0x113   :  { %1842 = vmatprep.subr.bf16.mxu0 %v2215_v0  ;;  %1821 = vmatpush3.bf16.msra.mxu1 %v2022_v33 }
 0x114   :  { %1822 = vmatprep.subr.bf16.mxu1 %v2215_v0 }
 0x117   :  { %1823 = vmatpush3.bf16.msra.mxu1 %v2024_v34 }
 0x118   :  { %1824 = vmatprep.subr.bf16.mxu1 %v2215_v0 }
 0x119   :  { %1839 = vmatmul.mubr.msk.bf16.vlgmr.msra.gmra.mxu0 %vm117_vm1, %v2018_v35 }
 0x11a   :  { %1843 = vmatpush3.bf16.msra.mxu0 %v2021_v36  ;;  %1858 = vmatprep.mubr.msk.bf16.mxu0 %vm2216_vm0, %v2215_v0 }
 0x11b   :  { %1844 = vmatprep.subr.bf16.mxu0 %v2215_v0  ;;  %1825 = vmatpush3.bf16.msra.mxu1 %v2026_v39 }
 0x11c   :  { %1826 = vmatprep.subr.bf16.mxu1 %v2215_v0 }
 0x11e   :  { %1845 = vmatpush3.bf16.msra.mxu0 %v2023_v37 }
 0x11f   :  { %1846 = vmatprep.subr.bf16.mxu0 %v2215_v0  ;;  %1827 = vmatpush3.bf16.msra.mxu1 %v2028_v41 }
 0x120   :  { %1828 = vmatprep.subr.bf16.mxu1 %v2215_v0 }
 0x122   :  { %1847 = vmatpush3.bf16.msra.mxu0 %v2025_v38 }
 0x123   :  { %1848 = vmatprep.subr.bf16.mxu0 %v2215_v0  ;;  %1829 = vmatpush3.bf16.msra.mxu1 %v2030_v43  ;;  %v2053_v43 = vld [vmem:[#allocation2 + $0x30] sm:$0xff]  }
 0x124   :  { %1830 = vmatprep.subr.bf16.mxu1 %v2215_v0 }
 0x126   :  { %1849 = vmatpush3.bf16.msra.mxu0 %v2027_v40 }
 0x127   :  { %1850 = vmatprep.subr.bf16.mxu0 %v2215_v0  ;;  %1831 = vmatpush3.bf16.msra.mxu1 %v2032_v45 }
 0x128   :  { %1868 = vmatprep.subr.bf16.mxu1 %v2215_v0 }
 0x12a   :  { %1851 = vmatpush3.bf16.msra.mxu0 %v2029_v42 }
 0x12b   :  { %1852 = vmatprep.subr.bf16.mxu0 %v2215_v0 }
 0x12e   :  { %1853 = vmatpush3.bf16.msra.mxu0 %v2031_v44 }
 0x12f   :  { %1854 = vmatprep.subr.bf16.mxu0 %v2215_v0 }
 0x132   :  { %1855 = vmatpush3.bf16.msra.mxu0 %v2033_v46  ;;  %v2055_v46 = vld [vmem:[#allocation8 + $0x1b8] sm:$0xff]  }
 0x133   :  { %1856 = vmatprep.subr.bf16.mxu0 %v2215_v0 }
 0x136   :  { %1857 = vmatpush3.bf16.msra.mxu0 %v2034_v47 }
 0x137   :  { %1862 = vmatprep.subr.bf16.mxu0 %v2215_v0 }
 0x1c9   :  { %v331_v48 = vpop.f32.mrf.mxu0  ;;  %v420_v49 = vpop.f32.mrf.mxu1 }
 0x1ca   :  { %v2364_v50 = vadd.f32 %v420_v49, %v331_v48  ;;  %v2056_v48 = vld [vmem:[#allocation8 + $0x1b0] sm:$0xff]   ;;  %v2054_v49 = vld [vmem:[#allocation2 + $0x38] sm:$0xff]  }
 0x1cb   :  { %v1788_v51 = vpop.f32.mrf.mxu0  ;;  %v1808_v52 = vpop.f32.mrf.mxu1 }
 0x1cc   :  { %v2057_v51 = vld [vmem:[#allocation8 + $0x1a8] sm:$0xff]   ;;  %v2059_v52 = vld [vmem:[#allocation8 + $0x1a0] sm:$0xff]  }
 0x1cd   :  { %v334_v53 = vpop.f32.mrf.mxu0  ;;  %v423_v54 = vpop.f32.mrf.mxu1 }
 0x1ce   :  { %v2366_v55 = vadd.f32 %v423_v54, %v334_v53  ;;  %v2061_v53 = vld [vmem:[#allocation8 + $0x198] sm:$0xff]   ;;  %v2062_v54 = vld [vmem:[#allocation8 + $0x1e8] sm:$0xff]  }
 0x1cf   :  { %v1789_v56 = vpop.f32.mrf.mxu0  ;;  %v1809_v57 = vpop.f32.mrf.mxu1 }
 0x1d0   :  { %v2064_v56 = vld [vmem:[#allocation8 + $0x1e0] sm:$0xff]   ;;  %v2065_v57 = vld [vmem:[#allocation8 + $0x188] sm:$0xff]  }
 0x1d1   :  { %v472_v58 = vpop.f32.mrf.mxu0 }
 0x1d3   :  { %v1814_v59 = vpop.f32.mrf.mxu0 }
 0x1d4   :  { %v2067_v59 = vld [vmem:[#allocation8 + $0x180] sm:$0xff]  }
 0x1d5   :  { %v475_v60 = vpop.f32.mrf.mxu0 }
 0x1d6   :  { %v479_v62 = vpack.c.bf16 %v475_v60, %v472_v58  ;;  %v2066_v58 = vld [vmem:[#allocation8 + $0x1d8] sm:$0xff]   ;;  %v2068_v60 = vld [vmem:[#allocation8 + $0x1d0] sm:$0xff]  }
 0x1d7   :  { %v1815_v63 = vpop.f32.mrf.mxu0 }
 0x1d8   :  { %1833 = vmatmul.mubr.bf16.vlgmr.msra.gmra.mxu1 %v479_v62  ;;  %v2072_v62 = vld [vmem:[#allocation8 + $0x1c0] sm:$0xff]  }
 0x1d9   :  { %v633_v2 = vpop.f32.mrf.mxu0  ;;  %1869 = vmatpush3.bf16.msra.mxu1 %v2037_v61  ;;  %1884 = vmatprep.mubr.msk.bf16.mxu1 %vm2216_vm0, %v2215_v0  ;;  %v2070_v61 = vld [vmem:[#allocation8 + $0x1c8] sm:$0xff]  }
 0x1da   :  { %1870 = vmatprep.subr.bf16.mxu1 %v2215_v0 }
 0x1db   :  { %v1840_v4 = vpop.f32.mrf.mxu0 }
 0x1dd   :  { %v636_v5 = vpop.f32.mrf.mxu0  ;;  %1871 = vmatpush3.bf16.msra.mxu1 %v2038_v3 }
 0x1de   :  { %v640_v6 = vpack.c.bf16 %v636_v5, %v633_v2  ;;  %1872 = vmatprep.subr.bf16.mxu1 %v2215_v0 }
 0x1df   :  { %v1841_v8 = vpop.f32.mrf.mxu0 }
 0x1e0   :  { %1859 = vmatmul.mubr.bf16.vlgmr.msra.gmra.mxu0 %v640_v6 }
 0x1e1   :  { %1863 = vmatpush3.bf16.msra.mxu0 %v2306_v1  ;;  %1864 = vmatprep.mubr.msk.bf16.mxu0 %vm2216_vm0, %v2215_v0 }
 0x1e2   :  { %1888 = vmatprep.subr.bf16.mxu0 %v2215_v0  ;;  %1873 = vmatpush3.bf16.msra.mxu1 %v2039_v7 }
 0x1e3   :  { %1874 = vmatprep.subr.bf16.mxu1 %v2215_v0 }
 0x1e6   :  { %1875 = vmatpush3.bf16.msra.mxu1 %v2041_v12 }
 0x1e7   :  { %1876 = vmatprep.subr.bf16.mxu1 %v2215_v0 }
 0x1e8   :  { %1865 = vmatmul.mubr.msk.bf16.vlgmr.msra.gmra.mxu0 %vm117_vm1, %v2035_v9 }
 0x1e9   :  { %1889 = vmatpush3.bf16.msra.mxu0 %v2306_v1  ;;  %1890 = vmatprep.mubr.msk.bf16.mxu0 %vm2216_vm0, %v2215_v0 }
 0x1ea   :  { %1894 = vmatprep.subr.bf16.mxu0 %v2215_v0  ;;  %1877 = vmatpush3.bf16.msra.mxu1 %v2043_v14  ;;  %v2069_v14 = vld [vmem:[#allocation10 + $0x38] sm:$0xff]  }
 0x1eb   :  { %1878 = vmatprep.subr.bf16.mxu1 %v2215_v0 }
 0x1ee   :  { %1879 = vmatpush3.bf16.msra.mxu1 %v2045_v16 }
 0x1ef   :  { %1880 = vmatprep.subr.bf16.mxu1 %v2215_v0 }
 0x1f0   :  { %1891 = vmatmul.mubr.msk.bf16.vlgmr.msra.gmra.mxu0 %vm117_vm1, %v2036_v10 }
 0x1f1   :  { %1910 = vmatprep.mubr.msk.bf16.mxu0 %vm2216_vm0, %v2215_v0  ;;  %1895 = vmatpush3.bf16.msra.mxu0 %v2040_v11 }
 0x1f2   :  { %1896 = vmatprep.subr.bf16.mxu0 %v2215_v0  ;;  %1881 = vmatpush3.bf16.msra.mxu1 %v2047_v18 }
 0x1f3   :  { %1882 = vmatprep.subr.bf16.mxu1 %v2215_v0 }
 0x1f5   :  { %1897 = vmatpush3.bf16.msra.mxu0 %v2042_v13 }
 0x1f6   :  { %1898 = vmatprep.subr.bf16.mxu0 %v2215_v0  ;;  %1883 = vmatpush3.bf16.msra.mxu1 %v2049_v20  ;;  %v2071_v20 = vld [vmem:[#allocation10 + $0x30] sm:$0xff]  }
 0x1f7   :  { %1914 = vmatprep.subr.bf16.mxu1 %v2215_v0 }
 0x1f9   :  { %1899 = vmatpush3.bf16.msra.mxu0 %v2044_v15 }
 0x1fa   :  { %1900 = vmatprep.subr.bf16.mxu0 %v2215_v0 }
 0x1fd   :  { %1901 = vmatpush3.bf16.msra.mxu0 %v2046_v17 }
 0x1fe   :  { %1902 = vmatprep.subr.bf16.mxu0 %v2215_v0 }
 0x201   :  { %1903 = vmatpush3.bf16.msra.mxu0 %v2048_v19 }
 0x202   :  { %1904 = vmatprep.subr.bf16.mxu0 %v2215_v0 }
 0x205   :  { %1905 = vmatpush3.bf16.msra.mxu0 %v2050_v21 }
 0x206   :  { %1906 = vmatprep.subr.bf16.mxu0 %v2215_v0 }
 0x209   :  { %1907 = vmatpush3.bf16.msra.mxu0 %v2051_v22 }
 0x20a   :  { %1908 = vmatprep.subr.bf16.mxu0 %v2215_v0 }
 0x20d   :  { %1909 = vmatpush3.bf16.msra.mxu0 %v2052_v23  ;;  %v2073_v23 = vld [vmem:[#allocation10 + $0x28] sm:$0xff]  }
 0x20e   :  { %1940 = vmatprep.subr.bf16.mxu0 %v2215_v0 }
 0x298   :  { %v579_v24 = vpop.f32.mrf.mxu1 }
 0x299   :  { %v586_v25 = vadd.f32 %v579_v24, %v2364_v50  ;;  %v2058_v50 = vld [vmem:[#allocation8 + $0x1f8] sm:$0xff]  }
 0x29a   :  { %v1834_v26 = vpop.f32.mrf.mxu1 }
 0x29b   :  { %v2074_v26 = vld [vmem:[#allocation10 + $0x20] sm:$0xff]  }
 0x29c   :  { %v582_v27 = vpop.f32.mrf.mxu1 }
 0x29d   :  { %v587_v28 = vadd.f32 %v582_v27, %v2366_v55  ;;  %v2063_v55 = vld [vmem:[#allocation8 + $0x190] sm:$0xff]   ;;  %v2075_v27 = vld [vmem:[#allocation10 + $0x18] sm:$0xff]  }
 0x29e   :  { %v1835_v29 = vpop.f32.mrf.mxu1 }
 0x29f   :  { %v2077_v29 = vld [vmem:[#allocation10 + $0x8] sm:$0xff]  }
 0x2a0   :  { %v740_v30 = vpop.f32.mrf.mxu0 }
 0x2a1   :  { %v2400_v31 = vadd.f32 %v740_v30, %v586_v25  ;;  %v2078_v30 = vld [vmem:[#allocation10] sm:$0xff]  }
 0x2a2   :  { %v1860_v32 = vpop.f32.mrf.mxu0 }
 0x2a4   :  { %v743_v33 = vpop.f32.mrf.mxu0 }
 0x2a5   :  { %v2402_v34 = vadd.f32 %v743_v33, %v587_v28  ;;  %v2076_v28 = vld [vmem:[#allocation10 + $0x10] sm:$0xff]  }
 0x2a6   :  { %v1861_v35 = vpop.f32.mrf.mxu0 }
 0x2a8   :  { %v794_v36 = vpop.f32.mrf.mxu0 }
 0x2aa   :  { %v1866_v37 = vpop.f32.mrf.mxu0 }
 0x2ac   :  { %v797_v38 = vpop.f32.mrf.mxu0 }
 0x2ad   :  { %v801_v39 = vpack.c.bf16 %v797_v38, %v794_v36 }
 0x2ae   :  { %v1867_v40 = vpop.f32.mrf.mxu0 }
 0x2af   :  { %1885 = vmatmul.mubr.bf16.vlgmr.msra.gmra.mxu1 %v801_v39 }
 0x2b0   :  { %1915 = vmatpush3.bf16.msra.mxu1 %v2306_v1  ;;  %v955_v41 = vpop.f32.mrf.mxu0  ;;  %1916 = vmatprep.mubr.msk.bf16.mxu1 %vm2216_vm0, %v2215_v0 }
 0x2b1   :  { %1920 = vmatprep.subr.bf16.mxu1 %v2215_v0 }
 0x2b2   :  { %v1892_v42 = vpop.f32.mrf.mxu0 }
 0x2b3   :  { %v1648_v42 = vld [vmem:[%s2464_s5] ss:$0 sm:$0xff] }
 0x2b4   :  { %v958_v44 = vpop.f32.mrf.mxu0 }
 0x2b5   :  { %v962_v45 = vpack.c.bf16 %v958_v44, %v955_v41 }
 0x2b6   :  { %v1893_v47 = vpop.f32.mrf.mxu0 }
 0x2b7   :  { %1911 = vmatmul.mubr.bf16.vlgmr.msra.gmra.mxu0 %v962_v45  ;;  %1917 = vmatmul.mubr.msk.bf16.vlgmr.msra.gmra.mxu1 %vm117_vm1, %v2053_v43 }
 0x2b8   :  { %1941 = vmatpush3.bf16.msra.mxu0 %v2306_v1  ;;  %1942 = vmatprep.mubr.msk.bf16.mxu0 %vm2216_vm0, %v2215_v0  ;;  %v2060_v1 = vld [vmem:[#allocation8 + $0x1f0] sm:$0xff]  }
 0x2b9   :  { %1921 = vmatpush3.bf16.msra.mxu1 %v2055_v46  ;;  %1946 = vmatprep.subr.bf16.mxu0 %v2215_v0 }
 0x2ba   :  { %1922 = vmatprep.subr.bf16.mxu1 %v2215_v0  ;;  %1936 = vmatprep.mubr.msk.bf16.mxu1 %vm2216_vm0, %v2215_v0 }
 0x2bd   :  { %1923 = vmatpush3.bf16.msra.mxu1 %v2056_v48 }
 0x2be   :  { %1924 = vmatprep.subr.bf16.mxu1 %v2215_v0 }
 0x2bf   :  { %1943 = vmatmul.mubr.msk.bf16.vlgmr.msra.gmra.mxu0 %vm117_vm1, %v2054_v49 }
 0x2c0   :  { %1947 = vmatpush3.bf16.msra.mxu0 %v2058_v50  ;;  %1962 = vmatprep.mubr.msk.bf16.mxu0 %vm2216_vm0, %v2215_v0 }
 0x2c1   :  { %1925 = vmatpush3.bf16.msra.mxu1 %v2057_v51  ;;  %1948 = vmatprep.subr.bf16.mxu0 %v2215_v0 }
 0x2c2   :  { %1926 = vmatprep.subr.bf16.mxu1 %v2215_v0 }
 0x2c4   :  { %1949 = vmatpush3.bf16.msra.mxu0 %v2060_v1  ;;  %v1659_v1 = vld [vmem:[%s2466_s7] ss:$0 sm:$0xff] }
 0x2c5   :  { %1927 = vmatpush3.bf16.msra.mxu1 %v2059_v52  ;;  %1950 = vmatprep.subr.bf16.mxu0 %v2215_v0 }
 0x2c6   :  { %1928 = vmatprep.subr.bf16.mxu1 %v2215_v0 }
 0x2c8   :  { %1951 = vmatpush3.bf16.msra.mxu0 %v2062_v54 }
 0x2c9   :  { %1929 = vmatpush3.bf16.msra.mxu1 %v2061_v53  ;;  %1952 = vmatprep.subr.bf16.mxu0 %v2215_v0 }
 0x2ca   :  { %1930 = vmatprep.subr.bf16.mxu1 %v2215_v0 }
 0x2cc   :  { %1953 = vmatpush3.bf16.msra.mxu0 %v2064_v56 }
 0x2cd   :  { %1931 = vmatpush3.bf16.msra.mxu1 %v2063_v55  ;;  %1954 = vmatprep.subr.bf16.mxu0 %v2215_v0  ;;  %v1660_v55 = vld [vmem:[%s2467_s8] ss:$0 sm:$0xff] }
 0x2ce   :  { %1932 = vmatprep.subr.bf16.mxu1 %v2215_v0 }
 0x2d0   :  { %1955 = vmatpush3.bf16.msra.mxu0 %v2066_v58 }
 0x2d1   :  { %1933 = vmatpush3.bf16.msra.mxu1 %v2065_v57  ;;  %1956 = vmatprep.subr.bf16.mxu0 %v2215_v0 }
 0x2d2   :  { %1934 = vmatprep.subr.bf16.mxu1 %v2215_v0 }
 0x2d4   :  { %1957 = vmatpush3.bf16.msra.mxu0 %v2068_v60 }
 0x2d5   :  { %1935 = vmatpush3.bf16.msra.mxu1 %v2067_v59  ;;  %1958 = vmatprep.subr.bf16.mxu0 %v2215_v0 }
 0x2d6   :  { %1966 = vmatprep.subr.bf16.mxu1 %v2215_v0 }
 0x2d8   :  { %1959 = vmatpush3.bf16.msra.mxu0 %v2070_v61 }
 0x2d9   :  { %1960 = vmatprep.subr.bf16.mxu0 %v2215_v0 }
 0x2dc   :  { %1961 = vmatpush3.bf16.msra.mxu0 %v2072_v62 }
 0x36f   :  { %v901_v63 = vpop.f32.mrf.mxu1 }
 0x370   :  { %v908_v2 = vadd.f32 %v901_v63, %v2400_v31  ;;  %v2079_v31 = vld [vmem:[#allocation7] sm:$0xff]  }
 0x371   :  { %v1886_v3 = vpop.f32.mrf.mxu1 }
 0x373   :  { %v904_v4 = vpop.f32.mrf.mxu1 }
 0x374   :  { %v909_v5 = vadd.f32 %v904_v4, %v2402_v34 }
 0x375   :  { %v1887_v6 = vpop.f32.mrf.mxu1 }
 0x377   :  { %v1062_v7 = vpop.f32.mrf.mxu0  ;;  %v1116_v8 = vpop.f32.mrf.mxu1 }
 0x378   :  { %v1069_v9 = vadd.f32 %v1062_v7, %v908_v2 }
 0x379   :  { %v1912_v10 = vpop.f32.mrf.mxu0  ;;  %v1918_v11 = vpop.f32.mrf.mxu1 }
 0x37b   :  { %v1065_v12 = vpop.f32.mrf.mxu0  ;;  %v1119_v13 = vpop.f32.mrf.mxu1 }
 0x37c   :  { %v1070_v15 = vadd.f32 %v1065_v12, %v909_v5  ;;  %v1123_v16 = vpack.c.bf16 %v1119_v13, %v1116_v8 }
 0x37d   :  { %v1913_v17 = vpop.f32.mrf.mxu0  ;;  %v1919_v18 = vpop.f32.mrf.mxu1 }
 0x37e   :  { %1937 = vmatmul.mubr.bf16.vlgmr.msra.gmra.mxu1 %v1123_v16 }
 0x37f   :  { %1967 = vmatpush3.bf16.msra.mxu1 %v2069_v14  ;;  %v1277_v19 = vpop.f32.mrf.mxu0  ;;  %1982 = vmatprep.mubr.msk.bf16.mxu1 %vm2216_vm0, %v2215_v0 }
 0x380   :  { %1968 = vmatprep.subr.bf16.mxu1 %v2215_v0 }
 0x381   :  { %v1944_v21 = vpop.f32.mrf.mxu0 }
 0x383   :  { %1969 = vmatpush3.bf16.msra.mxu1 %v2071_v20  ;;  %v1280_v22 = vpop.f32.mrf.mxu0 }
 0x384   :  { %v1284_v24 = vpack.c.bf16 %v1280_v22, %v1277_v19  ;;  %1970 = vmatprep.subr.bf16.mxu1 %v2215_v0 }
 0x385   :  { %v1945_v25 = vpop.f32.mrf.mxu0 }
 0x386   :  { %1963 = vmatmul.mubr.bf16.vlgmr.msra.gmra.mxu0 %v1284_v24 }
 0x387   :  { %1971 = vmatpush3.bf16.msra.mxu1 %v2073_v23 }
 0x388   :  { %1972 = vmatprep.subr.bf16.mxu1 %v2215_v0 }
 0x38b   :  { %1973 = vmatpush3.bf16.msra.mxu1 %v2074_v26 }
 0x38c   :  { %1974 = vmatprep.subr.bf16.mxu1 %v2215_v0 }
 0x38f   :  { %1975 = vmatpush3.bf16.msra.mxu1 %v2075_v27 }
 0x390   :  { %1976 = vmatprep.subr.bf16.mxu1 %v2215_v0 }
 0x393   :  { %1977 = vmatpush3.bf16.msra.mxu1 %v2076_v28 }
 0x394   :  { %1978 = vmatprep.subr.bf16.mxu1 %v2215_v0 }
 0x397   :  { %1979 = vmatpush3.bf16.msra.mxu1 %v2077_v29 }
 0x398   :  { %1980 = vmatprep.subr.bf16.mxu1 %v2215_v0  ;;  %v1649_v0 = vld [vmem:[%s2465_s6] ss:$0 sm:$0xff]  ;;  %s2217_s6 = smov [#allocation11]  }
 0x399   :  { %s1553_s17 = sshll.u32 %s2217_s6, 4  ;;  %s1554_s17 = int_to_ptr.vmem [resolvable:$true] %s1553_s17 }
 0x39a   :  { %s2180_s7 = scalar_lea.vmem %s1554_s17, 256  ;;  %p2185_p12 = scmp.lt.s32.totalorder %s1554_s17, %s1554_s17 }
 0x39b   :  { %1981 = vmatpush3.bf16.msra.mxu1 %v2078_v30  ;;  %p2181_p11 = scmp.ne.s32.totalorder %s1554_s17, %s2180_s7  ;;  %p2186_p13 = scmp.lt.s32.totalorder %s2180_s7, %s2180_s7 }
 0x39d   :  { %p2187_p0 = por %p2186_p13, %p2185_p12 }
 0x39e   :  { %1983 = vmatmul.mubr.bf16.vlgmr.msra.gmra.mxu1 %v2079_v31 }
 0x39f   :  { %p2188_p1 = pnand %p2187_p0, %p2181_p11 }
 0x43e   :  { %v1223_v32 = vpop.f32.mrf.mxu1 }
 0x43f   :  { %v1230_v40 = vadd.f32 %v1223_v32, %v1069_v9 }
 0x440   :  { %v1938_v33 = vpop.f32.mrf.mxu1 }
 0x442   :  { %v1226_v34 = vpop.f32.mrf.mxu1 }
 0x443   :  { %v1231_v43 = vadd.f32 %v1226_v34, %v1070_v15 }
 0x444   :  { %v1939_v35 = vpop.f32.mrf.mxu1 }
 0x446   :  { %v1384_v36 = vpop.f32.mrf.mxu0 }
 0x447   :  { %v1391_v41 = vadd.f32 %v1384_v36, %v1230_v40 }
 0x448   :  { %v1964_v37 = vpop.f32.mrf.mxu0 }
 0x449   :  { %v1400_v44 = vadd.f32 %v1648_v42, %v1391_v41 }
 0x44a   :  { %v1387_v38 = vpop.f32.mrf.mxu0 }
 0x44b   :  { %v1392_v45 = vadd.f32 %v1387_v38, %v1231_v43  ;;  %v1402_v49 = vmax.f32 %v1400_v44, 0.0 }
 0x44c   :  { %v1965_v39 = vpop.f32.mrf.mxu0 }
 0x44d   :  { %v1401_v50 = vadd.f32 %v1648_v42, %v1392_v45 }
 0x44f   :  { %v1403_v57 = vmax.f32 %v1401_v50, 0.0 }
 0x45e   :  { %v1517_v46 = vpop.f32.mrf.mxu1 }
 0x45f   :  { %v1518_v47 = vadd.f32 %v1649_v0, %v1517_v46 }
 0x460   :  { %v1984_v48 = vpop.f32.mrf.mxu1 }
 0x461   :  { %v1524_v51 = vmax.f32 %v1518_v47, 0.0 }
 0x462   :  { %v1520_v52 = vpop.f32.mrf.mxu1 }
 0x463   :  { %v1526_v53 = vadd.f32 %v1524_v51, %v1402_v49  ;;  %v1521_v54 = vadd.f32 %v1649_v0, %v1520_v52 }
 0x464   :  { %v1985_v56 = vpop.f32.mrf.mxu1 }
 0x465   :  { %v1535_v58 = vmul.f32 %v1659_v1, %v1526_v53  ;;  %v1525_v59 = vmax.f32 %v1521_v54, 0.0 }
 0x467   :  { %v1544_v60 = vadd.f32 %v1660_v55, %v1535_v58  ;;  %v1527_v61 = vadd.f32 %v1525_v59, %v1403_v57 }
 0x469   :  { %1546 = vst [vmem:[#allocation11] sm:$0xff] %v1544_v60  ;;  %v1536_v62 = vmul.f32 %v1659_v1, %v1527_v61 }
 0x46b   :  { %v1545_v63 = vadd.f32 %v1660_v55, %v1536_v62 }
 0x46d   :  { %1547 = vst [vmem:[#allocation11 + $0x8] sm:$0xff] %v1545_v63 }
 0x46e   :  { %2191 = shalt.err (!%p2188_p1)
}
 0x46f   :  { %s2218_s8 = smov 128   ;;  %s2219_s18 = smov 8  }
 0x470   :  { %1559 = dma.vmem_to_hbm [thread:$0]  %s1554_s17, 256, %s2468_s9, [#allocation4], %s2218_s8, %s2218_s8, %s2219_s18  }
 0x471   :  { %2206 = dma.done.wait [#allocation4], 256  }
 0x472   :  { %2207 = vsyncadd [#allocation4], 4294967040 }
 0x473   :  { %1563 = vsyncpa [#allocation3], 1 }
 0x474   :  { %1564 = vsyncpa [#allocation6], 1 }
 0x475   :  { %1565 = vsyncpa [#allocation9], 1 }
 0x476   :  { %1566 = vsyncpa [#allocation4], 1 }

</bundles_post_ra>
